<compile_context>
chip_gen: v7x
topology: tpu7x:2x2x1
jax: 0.10.0
libtpu: 0.0.40
codegen_flags: <defaults>
</compile_context>

<pallas_src>
import numpy as np
import jax
import jax.numpy as jnp
from jax.experimental import pallas as pl
from jax.experimental.pallas import tpu as pltpu

LANE = 128      # vreg lane width (last dim)


def _round_up(x, m):
    return ((x + m - 1) // m) * m


# --------------------------------------------------------------------------------------
# Kernel
# --------------------------------------------------------------------------------------
def make_mlp_kernel(n_hidden_layers):
    """Fused kernel: input Linear -> n x (Linear+Sigmoid) -> output Linear."""

    def kernel(*refs):
        x_ref = refs[0]          # [tm, in_pad]   bf16
        o_ref = refs[-1]         # [tm, out_pad]  bf16
        p = refs[1:-1]           # (w_in, b_in, [w_h, b_h]*, w_out, b_out); w bf16, b f32

        def linear(h, w_ref, b_ref):
            # bf16 MXU inputs, f32 accumulation, f32 bias add.
            return jnp.dot(h.astype(jnp.bfloat16), w_ref[...],
                           preferred_element_type=jnp.float32) + b_ref[...]

        def sigmoid_eup(z_f32):
            # Saturating sigmoid 0.5*(tanh(z/2)+1): tanh runs on the EUP slot and never
            # overflows for large |z|.  Result stored bf16 to halve the live intermediate
            # footprint (cast rides the VPU slot, which has slack here).
            return (0.5 * (jnp.tanh(0.5 * z_f32) + 1.0)).astype(jnp.bfloat16)

        # input Linear (no activation, matching the PyTorch module)
        h = linear(x_ref[...], p[0], p[1])                       # f32

        # hidden blocks: Linear followed by Sigmoid (bf16 between layers)
        for k in range(n_hidden_layers):
            h = sigmoid_eup(linear(h, p[2 + 2 * k], p[3 + 2 * k]))

        # output Linear (no activation); lane-dense bf16 store
        # TODO(synk): if a layer output width ever grows >> 512 lanes, tile its N dim with a
        # small unrolled fori_loop over 512-lane chunks to cap the live f32 MXU result.
        o_ref[...] = linear(h, p[-2], p[-1]).astype(o_ref.dtype)

    return kernel


# --------------------------------------------------------------------------------------
# Parameters (mimic torch.nn.Linear default init: U(-1/sqrt(in), 1/sqrt(in)))
# --------------------------------------------------------------------------------------
def init_linear_params(key, in_features, out_features):
    kw, kb = jax.random.split(key)
    bound = 1.0 / np.sqrt(in_features)
    # stored as [in, out] so the kernel can do x @ w directly
    w = jax.random.uniform(kw, (in_features, out_features), jnp.float32, -bound, bound)
    b = jax.random.uniform(kb, (1, out_features), jnp.float32, -bound, bound)
    return w, b


def make_mlp_params(key, hidden_sizes, input_dims=5, output_dims=5):
    hidden_sizes = np.asarray(hidden_sizes)
    keys = jax.random.split(key, len(hidden_sizes) + 1)
    params = []
    # self.input = Linear(input_dims, hidden_sizes[0])
    params.extend(init_linear_params(keys[0], input_dims, int(hidden_sizes[0])))
    # self.hidden = Sequential(Linear(H_k, H_{k+1}), Sigmoid()) for k in range(len(hidden_sizes)-1)
    for k in range(len(hidden_sizes) - 1):
        params.extend(
            init_linear_params(keys[1 + k], int(hidden_sizes[k]), int(hidden_sizes[k + 1]))
        )
    # self.out = Linear(hidden_sizes[-1], output_dims)
    params.extend(init_linear_params(keys[-1], int(hidden_sizes[-1]), output_dims))
    return params


# --------------------------------------------------------------------------------------
# Wrapper
# --------------------------------------------------------------------------------------
def _choose_tm(batch, tm_max=512):
    """Row-tile size: multiple of 16 (bf16 packing), prefer multiples of 128 (MXU M-dim),
    minimal trailing-tile padding, and >=2 tiles for large batches (v7x megacore)."""
    b16 = _round_up(max(batch, 1), 16)
    if b16 <= tm_max:
        if batch >= 256:                              # split so v7x's second TC isn't idle
            return _round_up(pl.cdiv(b16, 2), 128)
        return b16                                    # tiny batch: don't blow up padding
    n_tiles = pl.cdiv(batch, tm_max)
    if n_tiles % 2 == 1:                              # even tile count balances the 2 TCs
        n_tiles += 1
    return _round_up(pl.cdiv(batch, n_tiles), 128)


def _vmem_limit_bytes(param_bytes, tm, in_pad, out_pad, max_feat):
    """Generation-aware VMEM limit (~85% of physical), floored at the working-set estimate."""
    try:
        cap = int(pltpu.get_tpu_info().vmem_capacity_bytes)
    except Exception:
        cap = 64 << 20                                # conservative fallback (v7x per-TC VMEM)
    # params single-buffered; x/out tiles double-buffered bf16; headroom for f32 intermediates.
    act_bytes = 2 * tm * in_pad * 2 + 2 * tm * out_pad * 2 + 2 * tm * max_feat * 4
    want = param_bytes + act_bytes + (16 << 20)
    return int(min(int(0.85 * cap), max(32 << 20, want)))


def _run_pallas(x_p, padded, n_hidden_layers, tm, in_pad, out_pad, vmem_bytes,
                single_buffer_params):
    b_pad = x_p.shape[0]
    if single_buffer_params:
        # Grid-invariant specs -> no need for double buffering of the resident params.
        param_specs = [pl.BlockSpec(p.shape, lambda i: (0, 0), pipeline_mode=pl.Buffered(1))
                       for p in padded]
    else:
        param_specs = [pl.BlockSpec(p.shape, lambda i: (0, 0)) for p in padded]

    return pl.pallas_call(
        make_mlp_kernel(n_hidden_layers),
        out_shape=jax.ShapeDtypeStruct((b_pad, out_pad), jnp.bfloat16),
        grid_spec=pltpu.PrefetchScalarGridSpec(
            num_scalar_prefetch=0,
            grid=(b_pad // tm,),
            in_specs=[pl.BlockSpec((tm, in_pad), lambda i: (i, 0))] + param_specs,
            out_specs=pl.BlockSpec((tm, out_pad), lambda i: (i, 0)),
        ),
        compiler_params=pltpu.CompilerParams(
            dimension_semantics=("parallel",),        # shard batch tiles across TCs (v7x)
            vmem_limit_bytes=vmem_bytes,
        ),
    )(x_p, *padded)


def _mlp_forward_xla(x, params):
    """Plain XLA path for tiny configs (padded MXU work would be almost entirely zeros)."""
    n_hidden_layers = (len(params) - 4) // 2
    h = x @ params[0] + params[1]
    for k in range(n_hidden_layers):
        h = jax.nn.sigmoid(h @ params[2 + 2 * k] + params[3 + 2 * k])
    return h @ params[-2] + params[-1]


def mlp_forward(x, params, output_dims, *, tm_max=512, force_pallas=False):
    """Runs the fused Pallas MLP. Pads features to 128 lanes and batch to the row tile."""
    n_hidden_layers = (len(params) - 4) // 2
    batch, in_dims = x.shape
    max_width = max(max(w.shape) for w in params[0::2])

    # Tiny-config dispatch: the fused kernel only pays off once real dims approach the
    # 128-lane / 128+-row tiles; below that, per-call + per-tile overhead dominates.
    if not force_pallas and max_width <= 64 and batch <= 128:
        return _mlp_forward_xla(x, params)[:, :output_dims]

    # --- lane-dense padding of every layer; weights cast to bf16, biases stay f32 ---
    # Padded weight ROWS must stay zero so padded input features / sigmoid(0)=0.5 values in
    # padded hidden columns never leak into valid outputs.
    # TODO(synk): optional fp8 weight path (per-channel scales) on v7x when weights press
    # against the 64 MiB budget.
    padded = []
    for w, b in zip(params[0::2], params[1::2]):
        fi, fo = w.shape
        fi_p, fo_p = _round_up(fi, LANE), _round_up(fo, LANE)
        w_p = (jnp.zeros((fi_p, fo_p), jnp.float32)
               .at[:fi, :fo].set(w).astype(jnp.bfloat16))
        b_p = jnp.zeros((1, fo_p), jnp.float32).at[:, :fo].set(b)
        padded.extend((w_p, b_p))

    in_pad = padded[0].shape[0]
    out_pad = padded[-1].shape[1]
    max_feat = max(p.shape[-1] for p in padded[0::2])

    # --- batch tiling ---
    tm = _choose_tm(batch, tm_max)
    b_pad = _round_up(batch, tm)
    x_p = (jnp.zeros((b_pad, in_pad), jnp.float32)
           .at[:batch, :in_dims].set(x).astype(jnp.bfloat16))

    # --- VMEM budget ---
    # TODO(synk): if hidden widths ever grow so weights exceed the VMEM budget, switch to a
    # K/N-tiled grid with an accumulator scratch instead of keeping weights resident.
    param_bytes = sum(int(np.prod(p.shape)) * p.dtype.itemsize for p in padded)
    vmem_bytes = _vmem_limit_bytes(param_bytes, tm, in_pad, out_pad, max_feat)

    try:
        out = _run_pallas(x_p, padded, n_hidden_layers, tm, in_pad, out_pad, vmem_bytes,
                          single_buffer_params=True)
    except Exception:
        # Fallback if this jax version rejects Buffered(1) on grid-invariant specs.
        out = _run_pallas(x_p, padded, n_hidden_layers, tm, in_pad, out_pad, vmem_bytes,
                          single_buffer_params=False)

    return out[:batch, :output_dims].astype(jnp.float32)


def mlp_forward_ref(x, params):
    """Plain-JAX reference matching the kernel's bf16-matmul / f32-accumulate recipe."""
    n_hidden_layers = (len(params) - 4) // 2

    def lin(h, w, b):
        return jnp.dot(h.astype(jnp.bfloat16), w.astype(jnp.bfloat16),
                       preferred_element_type=jnp.float32) + b

    h = lin(x, params[0], params[1])
    for k in range(n_hidden_layers):
        h = jax.nn.sigmoid(lin(h, params[2 + 2 * k], params[3 + 2 * k]))
    return lin(h, params[-2], params[-1])


if __name__ == "__main__":
    input_dims = 5
    output_dims = 5
    hidden_sizes = np.array([32, 32])   # one Linear+Sigmoid hidden block
    batch = 8

    key = jax.random.PRNGKey(0)
    kx, kp = jax.random.split(key)
    x = jax.random.normal(kx, (batch, input_dims), jnp.float32)
    params = make_mlp_params(kp, hidden_sizes, input_dims, output_dims)

    # force_pallas=True so the fused kernel (not the tiny-config XLA path) is exercised.
    out = mlp_forward(x, params, output_dims, force_pallas=True)
    out = jax.block_until_ready(out)

    ref = mlp_forward_ref(x, params)
    # bf16 MXU inputs + bf16 intermediate/output storage => modest tolerance vs. f32-output ref
    np.testing.assert_allclose(np.asarray(out), np.asarray(ref), rtol=2e-2, atol=2e-2)

    print("KERNEL_OK")
</pallas_src>

<mosaic_0001>
module attributes {stable_mosaic.version = 11 : i64} {
  func.func @kernel(%arg0: i32, %arg1: memref<16x128xbf16, #tpu.memory_space<vmem>>, %arg2: memref<128x128xbf16, #tpu.memory_space<vmem>>, %arg3: memref<1x128xf32, #tpu.memory_space<vmem>>, %arg4: memref<128x128xbf16, #tpu.memory_space<vmem>>, %arg5: memref<1x128xf32, #tpu.memory_space<vmem>>, %arg6: memref<128x128xbf16, #tpu.memory_space<vmem>>, %arg7: memref<1x128xf32, #tpu.memory_space<vmem>>, %arg8: memref<16x128xbf16, #tpu.memory_space<vmem>>) attributes {dimension_semantics = [#tpu.dimension_semantics<parallel>], iteration_bounds = array<i64: 1>, scalar_prefetch = 0 : i64, scratch_operands = 0 : i64, tpu.core_type = #tpu.core_type<tc>, window_params = [{transform_indices = @transform_0, window_bounds = array<i64: 16, 128>}, {pipeline_mode = #tpu.pipeline_mode<synchronous>, transform_indices = @transform_1, window_bounds = array<i64: 128, 128>}, {pipeline_mode = #tpu.pipeline_mode<synchronous>, transform_indices = @transform_2, window_bounds = array<i64: 1, 128>}, {pipeline_mode = #tpu.pipeline_mode<synchronous>, transform_indices = @transform_3, window_bounds = array<i64: 128, 128>}, {pipeline_mode = #tpu.pipeline_mode<synchronous>, transform_indices = @transform_4, window_bounds = array<i64: 1, 128>}, {pipeline_mode = #tpu.pipeline_mode<synchronous>, transform_indices = @transform_5, window_bounds = array<i64: 128, 128>}, {pipeline_mode = #tpu.pipeline_mode<synchronous>, transform_indices = @transform_6, window_bounds = array<i64: 1, 128>}, {transform_indices = @transform_7, window_bounds = array<i64: 16, 128>}]} {
    %c0 = arith.constant 0 : index
    %c0_0 = arith.constant 0 : index
    %0 = vector.load %arg1[%c0, %c0_0] : memref<16x128xbf16, #tpu.memory_space<vmem>>, vector<16x128xbf16>
    %c0_1 = arith.constant 0 : index
    %c0_2 = arith.constant 0 : index
    %1 = vector.load %arg2[%c0_1, %c0_2] : memref<128x128xbf16, #tpu.memory_space<vmem>>, vector<128x128xbf16>
    %cst = arith.constant dense<0.000000e+00> : vector<16x128xf32>
    %2 = tpu.matmul %0, %1, %cst {dimension_numbers = #tpu.dot_dimension_numbers<[1], [0], [0], [1], [0, 0, 1, 1], [], []>} : vector<16x128xbf16>, vector<128x128xbf16>, vector<16x128xf32> -> vector<16x128xf32>
    %c0_3 = arith.constant 0 : index
    %c0_4 = arith.constant 0 : index
    %3 = vector.load %arg3[%c0_3, %c0_4] : memref<1x128xf32, #tpu.memory_space<vmem>>, vector<1x128xf32>
    %4 = vector.broadcast %3 : vector<1x128xf32> to vector<16x128xf32>
    %5 = arith.addf %2, %4 : vector<16x128xf32>
    %6 = arith.truncf %5 : vector<16x128xf32> to vector<16x128xbf16>
    %c0_5 = arith.constant 0 : index
    %c0_6 = arith.constant 0 : index
    %7 = vector.load %arg4[%c0_5, %c0_6] : memref<128x128xbf16, #tpu.memory_space<vmem>>, vector<128x128xbf16>
    %cst_7 = arith.constant dense<0.000000e+00> : vector<16x128xf32>
    %8 = tpu.matmul %6, %7, %cst_7 {dimension_numbers = #tpu.dot_dimension_numbers<[1], [0], [0], [1], [0, 0, 1, 1], [], []>} : vector<16x128xbf16>, vector<128x128xbf16>, vector<16x128xf32> -> vector<16x128xf32>
    %c0_8 = arith.constant 0 : index
    %c0_9 = arith.constant 0 : index
    %9 = vector.load %arg5[%c0_8, %c0_9] : memref<1x128xf32, #tpu.memory_space<vmem>>, vector<1x128xf32>
    %10 = vector.broadcast %9 : vector<1x128xf32> to vector<16x128xf32>
    %11 = arith.addf %8, %10 : vector<16x128xf32>
    %cst_10 = arith.constant 5.000000e-01 : f32
    %12 = vector.broadcast %cst_10 : f32 to vector<16x128xf32>
    %13 = arith.mulf %12, %11 : vector<16x128xf32>
    %14 = math.tanh %13 : vector<16x128xf32>
    %cst_11 = arith.constant 1.000000e+00 : f32
    %15 = vector.broadcast %cst_11 : f32 to vector<16x128xf32>
    %16 = arith.addf %14, %15 : vector<16x128xf32>
    %cst_12 = arith.constant 5.000000e-01 : f32
    %17 = vector.broadcast %cst_12 : f32 to vector<16x128xf32>
    %18 = arith.mulf %17, %16 : vector<16x128xf32>
    %19 = arith.truncf %18 : vector<16x128xf32> to vector<16x128xbf16>
    %c0_13 = arith.constant 0 : index
    %c0_14 = arith.constant 0 : index
    %20 = vector.load %arg6[%c0_13, %c0_14] : memref<128x128xbf16, #tpu.memory_space<vmem>>, vector<128x128xbf16>
    %cst_15 = arith.constant dense<0.000000e+00> : vector<16x128xf32>
    %21 = tpu.matmul %19, %20, %cst_15 {dimension_numbers = #tpu.dot_dimension_numbers<[1], [0], [0], [1], [0, 0, 1, 1], [], []>} : vector<16x128xbf16>, vector<128x128xbf16>, vector<16x128xf32> -> vector<16x128xf32>
    %c0_16 = arith.constant 0 : index
    %c0_17 = arith.constant 0 : index
    %22 = vector.load %arg7[%c0_16, %c0_17] : memref<1x128xf32, #tpu.memory_space<vmem>>, vector<1x128xf32>
    %23 = vector.broadcast %22 : vector<1x128xf32> to vector<16x128xf32>
    %24 = arith.addf %21, %23 : vector<16x128xf32>
    %25 = arith.truncf %24 : vector<16x128xf32> to vector<16x128xbf16>
    %c0_18 = arith.constant 0 : index
    %c0_19 = arith.constant 0 : index
    %26 = vector.load %arg8[%c0_18, %c0_19] : memref<16x128xbf16, #tpu.memory_space<vmem>>, vector<16x128xbf16>
    tpu.vector_store %arg8[%c0_18, %c0_19], %25 {strides = array<i32>} : memref<16x128xbf16, #tpu.memory_space<vmem>>, vector<16x128xbf16>,
    return
  }
  func.func @transform_0(%arg0: i32) -> (i32, i32) {
    %c0_i32 = arith.constant 0 : i32
    %c0_i32_0 = arith.constant 0 : i32
    return %arg0, %c0_i32 : i32, i32
  }
  func.func @transform_1(%arg0: i32) -> (i32, i32) {
    %c0_i32 = arith.constant 0 : i32
    %c0_i32_0 = arith.constant 0 : i32
    %c0_i32_1 = arith.constant 0 : i32
    return %c0_i32, %c0_i32_0 : i32, i32
  }
  func.func @transform_2(%arg0: i32) -> (i32, i32) {
    %c0_i32 = arith.constant 0 : i32
    %c0_i32_0 = arith.constant 0 : i32
    %c0_i32_1 = arith.constant 0 : i32
    return %c0_i32, %c0_i32_0 : i32, i32
  }
  func.func @transform_3(%arg0: i32) -> (i32, i32) {
    %c0_i32 = arith.constant 0 : i32
    %c0_i32_0 = arith.constant 0 : i32
    %c0_i32_1 = arith.constant 0 : i32
    return %c0_i32, %c0_i32_0 : i32, i32
  }
  func.func @transform_4(%arg0: i32) -> (i32, i32) {
    %c0_i32 = arith.constant 0 : i32
    %c0_i32_0 = arith.constant 0 : i32
    %c0_i32_1 = arith.constant 0 : i32
    return %c0_i32, %c0_i32_0 : i32, i32
  }
  func.func @transform_5(%arg0: i32) -> (i32, i32) {
    %c0_i32 = arith.constant 0 : i32
    %c0_i32_0 = arith.constant 0 : i32
    %c0_i32_1 = arith.constant 0 : i32
    return %c0_i32, %c0_i32_0 : i32, i32
  }
  func.func @transform_6(%arg0: i32) -> (i32, i32) {
    %c0_i32 = arith.constant 0 : i32
    %c0_i32_0 = arith.constant 0 : i32
    %c0_i32_1 = arith.constant 0 : i32
    return %c0_i32, %c0_i32_0 : i32, i32
  }
  func.func @transform_7(%arg0: i32) -> (i32, i32) {
    %c0_i32 = arith.constant 0 : i32
    %c0_i32_0 = arith.constant 0 : i32
    return %arg0, %c0_i32 : i32, i32
  }
}

module attributes {stable_mosaic.version = 11 : i64} {
  func.func @kernel(%arg0: i32, %arg1: memref<16x128xbf16, #tpu.memory_space<vmem>>, %arg2: memref<128x128xbf16, #tpu.memory_space<vmem>>, %arg3: memref<1x128xf32, #tpu.memory_space<vmem>>, %arg4: memref<128x128xbf16, #tpu.memory_space<vmem>>, %arg5: memref<1x128xf32, #tpu.memory_space<vmem>>, %arg6: memref<128x128xbf16, #tpu.memory_space<vmem>>, %arg7: memref<1x128xf32, #tpu.memory_space<vmem>>, %arg8: memref<16x128xbf16, #tpu.memory_space<vmem>>) attributes {dimension_semantics = [#tpu.dimension_semantics<parallel>], iteration_bounds = array<i64: 1>, scalar_prefetch = 0 : i64, scratch_operands = 0 : i64, tpu.core_type = #tpu.core_type<tc>, window_params = [{transform_indices = @transform_0, window_bounds = array<i64: 16, 128>}, {pipeline_mode = #tpu.pipeline_mode<synchronous>, transform_indices = @transform_1, window_bounds = array<i64: 128, 128>}, {pipeline_mode = #tpu.pipeline_mode<synchronous>, transform_indices = @transform_2, window_bounds = array<i64: 1, 128>}, {pipeline_mode = #tpu.pipeline_mode<synchronous>, transform_indices = @transform_3, window_bounds = array<i64: 128, 128>}, {pipeline_mode = #tpu.pipeline_mode<synchronous>, transform_indices = @transform_4, window_bounds = array<i64: 1, 128>}, {pipeline_mode = #tpu.pipeline_mode<synchronous>, transform_indices = @transform_5, window_bounds = array<i64: 128, 128>}, {pipeline_mode = #tpu.pipeline_mode<synchronous>, transform_indices = @transform_6, window_bounds = array<i64: 1, 128>}, {transform_indices = @transform_7, window_bounds = array<i64: 16, 128>}]} {
    %c0 = arith.constant 0 : index
    %c0_0 = arith.constant 0 : index
    %0 = vector.load %arg1[%c0, %c0_0] : memref<16x128xbf16, #tpu.memory_space<vmem>>, vector<16x128xbf16>
    %c0_1 = arith.constant 0 : index
    %c0_2 = arith.constant 0 : index
    %1 = vector.load %arg2[%c0_1, %c0_2] : memref<128x128xbf16, #tpu.memory_space<vmem>>, vector<128x128xbf16>
    %cst = arith.constant dense<0.000000e+00> : vector<16x128xf32>
    %2 = tpu.matmul %0, %1, %cst {dimension_numbers = #tpu.dot_dimension_numbers<[1], [0], [0], [1], [0, 0, 1, 1], [], []>} : vector<16x128xbf16>, vector<128x128xbf16>, vector<16x128xf32> -> vector<16x128xf32>
    %c0_3 = arith.constant 0 : index
    %c0_4 = arith.constant 0 : index
    %3 = vector.load %arg3[%c0_3, %c0_4] : memref<1x128xf32, #tpu.memory_space<vmem>>, vector<1x128xf32>
    %4 = vector.broadcast %3 : vector<1x128xf32> to vector<16x128xf32>
    %5 = arith.addf %2, %4 : vector<16x128xf32>
    %6 = arith.truncf %5 : vector<16x128xf32> to vector<16x128xbf16>
    %c0_5 = arith.constant 0 : index
    %c0_6 = arith.constant 0 : index
    %7 = vector.load %arg4[%c0_5, %c0_6] : memref<128x128xbf16, #tpu.memory_space<vmem>>, vector<128x128xbf16>
    %cst_7 = arith.constant dense<0.000000e+00> : vector<16x128xf32>
    %8 = tpu.matmul %6, %7, %cst_7 {dimension_numbers = #tpu.dot_dimension_numbers<[1], [0], [0], [1], [0, 0, 1, 1], [], []>} : vector<16x128xbf16>, vector<128x128xbf16>, vector<16x128xf32> -> vector<16x128xf32>
    %c0_8 = arith.constant 0 : index
    %c0_9 = arith.constant 0 : index
    %9 = vector.load %arg5[%c0_8, %c0_9] : memref<1x128xf32, #tpu.memory_space<vmem>>, vector<1x128xf32>
    %10 = vector.broadcast %9 : vector<1x128xf32> to vector<16x128xf32>
    %11 = arith.addf %8, %10 : vector<16x128xf32>
    %cst_10 = arith.constant 5.000000e-01 : f32
    %12 = vector.broadcast %cst_10 : f32 to vector<16x128xf32>
    %13 = arith.mulf %12, %11 : vector<16x128xf32>
    %14 = math.tanh %13 : vector<16x128xf32>
    %cst_11 = arith.constant 1.000000e+00 : f32
    %15 = vector.broadcast %cst_11 : f32 to vector<16x128xf32>
    %16 = arith.addf %14, %15 : vector<16x128xf32>
    %cst_12 = arith.constant 5.000000e-01 : f32
    %17 = vector.broadcast %cst_12 : f32 to vector<16x128xf32>
    %18 = arith.mulf %17, %16 : vector<16x128xf32>
    %19 = arith.truncf %18 : vector<16x128xf32> to vector<16x128xbf16>
    %c0_13 = arith.constant 0 : index
    %c0_14 = arith.constant 0 : index
    %20 = vector.load %arg6[%c0_13, %c0_14] : memref<128x128xbf16, #tpu.memory_space<vmem>>, vector<128x128xbf16>
    %cst_15 = arith.constant dense<0.000000e+00> : vector<16x128xf32>
    %21 = tpu.matmul %19, %20, %cst_15 {dimension_numbers = #tpu.dot_dimension_numbers<[1], [0], [0], [1], [0, 0, 1, 1], [], []>} : vector<16x128xbf16>, vector<128x128xbf16>, vector<16x128xf32> -> vector<16x128xf32>
    %c0_16 = arith.constant 0 : index
    %c0_17 = arith.constant 0 : index
    %22 = vector.load %arg7[%c0_16, %c0_17] : memref<1x128xf32, #tpu.memory_space<vmem>>, vector<1x128xf32>
    %23 = vector.broadcast %22 : vector<1x128xf32> to vector<16x128xf32>
    %24 = arith.addf %21, %23 : vector<16x128xf32>
    %25 = arith.truncf %24 : vector<16x128xf32> to vector<16x128xbf16>
    %c0_18 = arith.constant 0 : index
    %c0_19 = arith.constant 0 : index
    %26 = vector.load %arg8[%c0_18, %c0_19] : memref<16x128xbf16, #tpu.memory_space<vmem>>, vector<16x128xbf16>
    tpu.vector_store %arg8[%c0_18, %c0_19], %25 {strides = array<i32>} : memref<16x128xbf16, #tpu.memory_space<vmem>>, vector<16x128xbf16>,
    return
  }
  func.func @transform_0(%arg0: i32) -> (i32, i32) {
    %c0_i32 = arith.constant 0 : i32
    %c0_i32_0 = arith.constant 0 : i32
    return %arg0, %c0_i32 : i32, i32
  }
  func.func @transform_1(%arg0: i32) -> (i32, i32) {
    %c0_i32 = arith.constant 0 : i32
    %c0_i32_0 = arith.constant 0 : i32
    %c0_i32_1 = arith.constant 0 : i32
    return %c0_i32, %c0_i32_0 : i32, i32
  }
  func.func @transform_2(%arg0: i32) -> (i32, i32) {
    %c0_i32 = arith.constant 0 : i32
    %c0_i32_0 = arith.constant 0 : i32
    %c0_i32_1 = arith.constant 0 : i32
    return %c0_i32, %c0_i32_0 : i32, i32
  }
  func.func @transform_3(%arg0: i32) -> (i32, i32) {
    %c0_i32 = arith.constant 0 : i32
    %c0_i32_0 = arith.constant 0 : i32
    %c0_i32_1 = arith.constant 0 : i32
    return %c0_i32, %c0_i32_0 : i32, i32
  }
  func.func @transform_4(%arg0: i32) -> (i32, i32) {
    %c0_i32 = arith.constant 0 : i32
    %c0_i32_0 = arith.constant 0 : i32
    %c0_i32_1 = arith.constant 0 : i32
    return %c0_i32, %c0_i32_0 : i32, i32
  }
  func.func @transform_5(%arg0: i32) -> (i32, i32) {
    %c0_i32 = arith.constant 0 : i32
    %c0_i32_0 = arith.constant 0 : i32
    %c0_i32_1 = arith.constant 0 : i32
    return %c0_i32, %c0_i32_0 : i32, i32
  }
  func.func @transform_6(%arg0: i32) -> (i32, i32) {
    %c0_i32 = arith.constant 0 : i32
    %c0_i32_0 = arith.constant 0 : i32
    %c0_i32_1 = arith.constant 0 : i32
    return %c0_i32, %c0_i32_0 : i32, i32
  }
  func.func @transform_7(%arg0: i32) -> (i32, i32) {
    %c0_i32 = arith.constant 0 : i32
    %c0_i32_0 = arith.constant 0 : i32
    return %arg0, %c0_i32 : i32, i32
  }
}

</mosaic_0001>

<bundles_post_ra>
// kernel: tpu_custom_call.1
= control target key start
LH: loop header
LB: loop body
LE: loop exit
PB: predicated region body
PF: predicated region fallthrough
CT: control target
= control target key end

     0   :  { %12 = vsyncpa [#allocation3], 0  ;;  %s923_s0 = inlined_call_operand.hbm [shape: bf16[16,128], index: 0, kind: input, shape index: {}]   ;;  %s924_s1 = inlined_call_operand.hbm [shape: bf16[128,128], index: 1, kind: input, shape index: {}]   ;;  %s925_s2 = inlined_call_operand.vmem [shape: f32[1,128], index: 2, kind: input, shape index: {}]   ;;  %s926_s3 = inlined_call_operand.hbm [shape: bf16[128,128], index: 3, kind: input, shape index: {}]   ;;  %s927_s4 = inlined_call_operand.vmem [shape: f32[1,128], index: 4, kind: input, shape index: {}]   ;;  %s928_s5 = inlined_call_operand.hbm [shape: bf16[128,128], index: 5, kind: input, shape index: {}]   ;;  %s929_s6 = inlined_call_operand.vmem [shape: f32[1,128], index: 6, kind: input, shape index: {}]   ;;  %s930_s7 = inlined_call_operand.hbm [shape: bf16[16,128], index: 7, kind: output, shape index: {}]  }
   0x1   :  { %13 = vsyncpa [#allocation6], 0 }
   0x2   :  { %14 = vsyncpa [#allocation9], 0 }
   0x3   :  { %15 = vsyncpa [#allocation4], 0  ;;  %s746_s24 = smov [#allocation5]   ;;  %s747_s26 = smov [#allocation2]  }
   0x4   :  { %s33_s25 = sshll.u32 %s746_s24, 4  ;;  %s21_s27 = sshll.u32 %s747_s26, 4  ;;  %s34_s25 = int_to_ptr.vmem [resolvable:$true] %s33_s25  ;;  %s795_s27 = int_to_ptr.vmem [resolvable:$true] %s21_s27 }
   0x5   :  { %s628_s30 = scalar_lea.hbm %s924_s1, 1024 }
   0x6   :  { %p629_p0 = scmp.ne.s32.totalorder %s924_s1, %s628_s30  ;;  %p632_p1 = scmp.lt.u32.totalorder %s628_s30, %s924_s1 }
   0x8   :  { %p634_p2 = pnand %p632_p1, %p629_p0 }
   0xa   :  { %637 = shalt.err (!%p634_p2)
}
   0xb   :  { %s638_s12 = scalar_lea.vmem %s34_s25, 1024  ;;  %p643_p4 = scmp.lt.s32.totalorder %s34_s25, %s34_s25 }
   0xc   :  { %p639_p3 = scmp.ne.s32.totalorder %s34_s25, %s638_s12  ;;  %p644_p5 = scmp.lt.s32.totalorder %s638_s12, %s638_s12 }
   0xe   :  { %p645_p6 = por %p644_p5, %p643_p4 }
  0x10   :  { %p646_p7 = pnand %p645_p6, %p639_p3 }
  0x12   :  { %649 = shalt.err (!%p646_p7)
}
  0x13   :  { %s748_s13 = smov 64   ;;  %s749_s14 = smov 4  }
  0x14   :  { %39 = dma.hbm_to_vmem [thread:$0]  %s924_s1, 1024, %s34_s25, [#allocation6], %s748_s13, %s748_s13, %s749_s14  }
  0x15   :  { %s650_s19 = scalar_lea.hbm %s923_s0, 128 }
  0x16   :  { %p651_p8 = scmp.ne.s32.totalorder %s923_s0, %s650_s19  ;;  %p654_p9 = scmp.lt.u32.totalorder %s650_s19, %s923_s0 }
  0x18   :  { %p656_p10 = pnand %p654_p9, %p651_p8 }
  0x1a   :  { %659 = shalt.err (!%p656_p10)
}
  0x1b   :  { %s660_s24 = scalar_lea.vmem %s795_s27, 128  ;;  %p665_p12 = scmp.lt.s32.totalorder %s795_s27, %s795_s27 }
  0x1c   :  { %p661_p11 = scmp.ne.s32.totalorder %s795_s27, %s660_s24  ;;  %p666_p13 = scmp.lt.s32.totalorder %s660_s24, %s660_s24 }
  0x1e   :  { %p667_p0 = por %p666_p13, %p665_p12 }
  0x20   :  { %p668_p1 = pnand %p667_p0, %p661_p11 }
  0x22   :  { %671 = shalt.err (!%p668_p1)
}
  0x23   :  { %27 = dma.hbm_to_vmem [thread:$0]  %s923_s0, 128, %s795_s27, [#allocation3], %s748_s13, %s748_s13, %s749_s14  }
  0x24   :  { %s750_s26 = smov [#allocation7]   ;;  %s751_s29 = smov [#allocation8]  }
  0x25   :  { %s47_s28 = sshll.u32 %s750_s26, 4  ;;  %s61_s30 = sshll.u32 %s751_s29, 4  ;;  %s48_s28 = int_to_ptr.vmem [resolvable:$true] %s47_s28  ;;  %s832_s30 = int_to_ptr.vmem [resolvable:$true] %s61_s30 }
  0x26   :  { %s672_s10 = scalar_lea.hbm %s926_s3, 1024 }
  0x27   :  { %p673_p2 = scmp.ne.s32.totalorder %s926_s3, %s672_s10  ;;  %p676_p3 = scmp.lt.u32.totalorder %s672_s10, %s926_s3 }
  0x29   :  { %p678_p4 = pnand %p676_p3, %p673_p2 }
  0x2b   :  { %681 = shalt.err (!%p678_p4)
}
  0x2c   :  { %s682_s0 = scalar_lea.vmem %s48_s28, 1024  ;;  %p687_p6 = scmp.lt.s32.totalorder %s48_s28, %s48_s28 }
  0x2d   :  { %p683_p5 = scmp.ne.s32.totalorder %s48_s28, %s682_s0  ;;  %p688_p7 = scmp.lt.s32.totalorder %s682_s0, %s682_s0 }
  0x2f   :  { %p689_p8 = por %p688_p7, %p687_p6 }
  0x31   :  { %p690_p9 = pnand %p689_p8, %p683_p5 }
  0x33   :  { %693 = shalt.err (!%p690_p9)
}
  0x34   :  { %53 = dma.hbm_to_vmem [thread:$0]  %s926_s3, 1024, %s48_s28, [#allocation6], %s748_s13, %s748_s13, %s749_s14  }
  0x35   :  { %s694_s20 = scalar_lea.hbm %s928_s5, 1024 }
  0x36   :  { %p695_p10 = scmp.ne.s32.totalorder %s928_s5, %s694_s20  ;;  %p698_p11 = scmp.lt.u32.totalorder %s694_s20, %s928_s5 }
  0x38   :  { %p700_p12 = pnand %p698_p11, %p695_p10 }
  0x3a   :  { %703 = shalt.err (!%p700_p12)
}
  0x3b   :  { %s704_s1 = scalar_lea.vmem %s832_s30, 1024  ;;  %p709_p0 = scmp.lt.s32.totalorder %s832_s30, %s832_s30 }
  0x3c   :  { %p705_p13 = scmp.ne.s32.totalorder %s832_s30, %s704_s1  ;;  %p710_p1 = scmp.lt.s32.totalorder %s704_s1, %s704_s1 }
  0x3e   :  { %p711_p2 = por %p710_p1, %p709_p0 }
  0x40   :  { %p712_p3 = pnand %p711_p2, %p705_p13 }
  0x42   :  { %715 = shalt.err (!%p712_p3)
}
  0x43   :  { %67 = dma.hbm_to_vmem [thread:$0]  %s928_s5, 1024, %s832_s30, [#allocation9], %s748_s13, %s748_s13, %s749_s14  }
  0x44   :  { %738 = dma.done.wait [#allocation3], 128  }
  0x45   :  { %739 = vsyncadd [#allocation3], 4294967168 }
  0x46   :  { %740 = dma.done.wait [#allocation6], 2048  }
  0x47   :  { %741 = vsyncadd [#allocation6], 4294965248 }
  0x48   :  { %742 = dma.done.wait [#allocation9], 1024  }
  0x49   :  { %743 = vsyncadd [#allocation9], 4294966272  ;;  %v752_v0 = vmov 0.0   ;;  %vm753_vm0 = vmmov 0   ;;  %v599_v1 = vld [vmem:[#allocation5] sm:$0xff]   ;;  %v600_v2 = vld [vmem:[#allocation5 + $0x8] sm:$0xff]  }
  0x4a   :  { %530 = vmatprep.subr.bf16.mxu0 %v752_v0  ;;  %546 = vmatprep.mubr.msk.bf16.mxu0 %vm753_vm0, %v752_v0  ;;  %v601_v3 = vld [vmem:[#allocation5 + $0x10] sm:$0xff]   ;;  %v608_v4 = vld [vmem:[#allocation7] sm:$0xff]   ;;  %v602_v5 = vld [vmem:[#allocation5 + $0x18] sm:$0xff]   ;;  %s754_s30 = smov [#allocation10]  }
  0x4b   :  { %550 = vmatprep.subr.bf16.mxu1 %v752_v0  ;;  %566 = vmatprep.mubr.msk.bf16.mxu1 %vm753_vm0, %v752_v0  ;;  %v609_v6 = vld [vmem:[#allocation7 + $0x8] sm:$0xff]   ;;  %v603_v7 = vld [vmem:[#allocation5 + $0x20] sm:$0xff]   ;;  %v610_v8 = vld [vmem:[#allocation7 + $0x10] sm:$0xff]   ;;  %s452_s8 = sshll.u32 %s754_s30, 4  ;;  %s453_s8 = int_to_ptr.vmem [resolvable:$true] %s452_s8 }
  0x4c   :  { %531 = vmatpush3.bf16.msra.mxu0 %v599_v1  ;;  %551 = vmatpush3.bf16.msra.mxu1 %v608_v4  ;;  %v604_v9 = vld [vmem:[#allocation5 + $0x28] sm:$0xff]   ;;  %v611_v10 = vld [vmem:[#allocation7 + $0x18] sm:$0xff]   ;;  %v605_v11 = vld [vmem:[#allocation5 + $0x30] sm:$0xff]   ;;  %s716_s9 = scalar_lea.vmem %s453_s8, 128  ;;  %p721_p5 = scmp.lt.s32.totalorder %s453_s8, %s453_s8 }
  0x4d   :  { %532 = vmatprep.subr.bf16.mxu0 %v752_v0  ;;  %552 = vmatprep.subr.bf16.mxu1 %v752_v0  ;;  %v612_v12 = vld [vmem:[#allocation7 + $0x20] sm:$0xff]   ;;  %v606_v13 = vld [vmem:[#allocation5 + $0x38] sm:$0xff]   ;;  %v613_v14 = vld [vmem:[#allocation7 + $0x28] sm:$0xff]   ;;  %p717_p4 = scmp.ne.s32.totalorder %s453_s8, %s716_s9  ;;  %p722_p6 = scmp.lt.s32.totalorder %s716_s9, %s716_s9 }
  0x4e   :  { %v607_v15 = vld [vmem:[#allocation2] sm:$0xff]   ;;  %v614_v16 = vld [vmem:[#allocation7 + $0x30] sm:$0xff]   ;;  %v616_v18 = vld [vmem:[#allocation8] sm:$0xff]  }
  0x4f   :  { %v615_v17 = vld [vmem:[#allocation7 + $0x38] sm:$0xff]   ;;  %v617_v19 = vld [vmem:[#allocation8 + $0x8] sm:$0xff]   ;;  %v618_v28 = vld [vmem:[#allocation8 + $0x10] sm:$0xff]   ;;  %p723_p7 = por %p722_p6, %p721_p5 }
  0x50   :  { %533 = vmatpush3.bf16.msra.mxu0 %v600_v2  ;;  %553 = vmatpush3.bf16.msra.mxu1 %v609_v6  ;;  %v466_v20 = vld [vmem:[%s925_s2] ss:$0 sm:$0xff]  ;;  %v620_v30 = vld [vmem:[#allocation8 + $0x20] sm:$0xff]   ;;  %v621_v31 = vld [vmem:[#allocation8 + $0x28] sm:$0xff]  }
  0x51   :  { %534 = vmatprep.subr.bf16.mxu0 %v752_v0  ;;  %554 = vmatprep.subr.bf16.mxu1 %v752_v0  ;;  %v619_v29 = vld [vmem:[#allocation8 + $0x18] sm:$0xff]   ;;  %v622_v32 = vld [vmem:[#allocation8 + $0x30] sm:$0xff]   ;;  %p724_p8 = pnand %p723_p7, %p717_p4 }
  0x52   :  { %v623_v33 = vld [vmem:[#allocation8 + $0x38] sm:$0xff]  }
  0x53   :  { %v476_v34 = vld [vmem:[%s927_s4] ss:$0 sm:$0xff] }
  0x54   :  { %535 = vmatpush3.bf16.msra.mxu0 %v601_v3  ;;  %555 = vmatpush3.bf16.msra.mxu1 %v610_v8  ;;  %v485_v50 = vld [vmem:[%s929_s6] ss:$0 sm:$0xff] }
  0x55   :  { %536 = vmatprep.subr.bf16.mxu0 %v752_v0  ;;  %556 = vmatprep.subr.bf16.mxu1 %v752_v0 }
  0x58   :  { %537 = vmatpush3.bf16.msra.mxu0 %v602_v5  ;;  %557 = vmatpush3.bf16.msra.mxu1 %v611_v10 }
  0x59   :  { %538 = vmatprep.subr.bf16.mxu0 %v752_v0  ;;  %558 = vmatprep.subr.bf16.mxu1 %v752_v0 }
  0x5c   :  { %539 = vmatpush3.bf16.msra.mxu0 %v603_v7  ;;  %559 = vmatpush3.bf16.msra.mxu1 %v612_v12 }
  0x5d   :  { %540 = vmatprep.subr.bf16.mxu0 %v752_v0  ;;  %560 = vmatprep.subr.bf16.mxu1 %v752_v0 }
  0x60   :  { %541 = vmatpush3.bf16.msra.mxu0 %v604_v9  ;;  %561 = vmatpush3.bf16.msra.mxu1 %v613_v14 }
  0x61   :  { %542 = vmatprep.subr.bf16.mxu0 %v752_v0  ;;  %562 = vmatprep.subr.bf16.mxu1 %v752_v0 }
  0x64   :  { %543 = vmatpush3.bf16.msra.mxu0 %v605_v11  ;;  %563 = vmatpush3.bf16.msra.mxu1 %v614_v16 }
  0x65   :  { %544 = vmatprep.subr.bf16.mxu0 %v752_v0  ;;  %564 = vmatprep.subr.bf16.mxu1 %v752_v0 }
  0x68   :  { %545 = vmatpush3.bf16.msra.mxu0 %v606_v13  ;;  %565 = vmatpush3.bf16.msra.mxu1 %v615_v17 }
  0x69   :  { %570 = vmatprep.subr.bf16.mxu0 %v752_v0 }
  0x6b   :  { %547 = vmatmul.mubr.bf16.vlgmr.msra.gmra.mrb[0].mxu0 %v607_v15 }
  0x6c   :  { %586 = vmatprep.mubr.msk.bf16.mxu0 %vm753_vm0, %v752_v0  ;;  %571 = vmatpush3.bf16.msra.mxu0 %v616_v18 }
  0x6d   :  { %572 = vmatprep.subr.bf16.mxu0 %v752_v0 }
  0x70   :  { %573 = vmatpush3.bf16.msra.mxu0 %v617_v19 }
  0x71   :  { %574 = vmatprep.subr.bf16.mxu0 %v752_v0 }
  0x74   :  { %575 = vmatpush3.bf16.msra.mxu0 %v618_v28 }
  0x75   :  { %576 = vmatprep.subr.bf16.mxu0 %v752_v0 }
  0x78   :  { %577 = vmatpush3.bf16.msra.mxu0 %v619_v29 }
  0x79   :  { %578 = vmatprep.subr.bf16.mxu0 %v752_v0 }
  0x7c   :  { %579 = vmatpush3.bf16.msra.mxu0 %v620_v30 }
  0x7d   :  { %580 = vmatprep.subr.bf16.mxu0 %v752_v0 }
  0x80   :  { %581 = vmatpush3.bf16.msra.mxu0 %v621_v31 }
  0x81   :  { %582 = vmatprep.subr.bf16.mxu0 %v752_v0 }
  0x84   :  { %583 = vmatpush3.bf16.msra.mxu0 %v622_v32 }
  0x85   :  { %584 = vmatprep.subr.bf16.mxu0 %v752_v0 }
  0x88   :  { %585 = vmatpush3.bf16.msra.mxu0 %v623_v33 }
 0x13e   :  { %v196_v21 = vpop.f32.mrb[0].mxu0 }
 0x13f   :  { %v548_v22 = vpop.f32.mrb[1].mxu0  ;;  %v197_v24 = vadd.f32 %v466_v20, %v196_v21 }
 0x140   :  { %v199_v23 = vpop.f32.mrb[2].mxu0 }
 0x141   :  { %v200_v25 = vadd.f32 %v466_v20, %v199_v23  ;;  %v549_v26 = vpop.f32.mrb[3].mxu0 }
 0x143   :  { %v203_v27 = vpack.c.bf16 %v200_v25, %v197_v24 }
 0x145   :  { %567 = vmatmul.mubr.bf16.vlgmr.msra.gmra.mrb[0].mxu1 %v203_v27 }
 0x218   :  { %v309_v35 = vpop.f32.mrb[0].mxu1 }
 0x219   :  { %v310_v36 = vadd.f32 %v476_v34, %v309_v35  ;;  %v568_v37 = vpop.f32.mrb[1].mxu1 }
 0x21a   :  { %v312_v38 = vpop.f32.mrb[2].mxu1 }
 0x21b   :  { %v316_v39 = vmul.f32 0.5, %v310_v36  ;;  %v313_v40 = vadd.f32 %v476_v34, %v312_v38  ;;  %v569_v41 = vpop.f32.mrb[3].mxu1 }
 0x21d   :  { %624 = vtanh.f32 %v316_v39  ;;  %v317_v42 = vmul.f32 0.5, %v313_v40 }
 0x21f   :  { %626 = vtanh.f32 %v317_v42 }
 0x227   :  { %v625_v43 = vpop.eup %624 }
 0x228   :  { %v320_v44 = vadd.f32 1.0, %v625_v43 }
 0x229   :  { %v627_v45 = vpop.eup %626 }
 0x22a   :  { %v321_v46 = vadd.f32 1.0, %v627_v45  ;;  %v322_v47 = vmul.f32 0.5, %v320_v44 }
 0x22c   :  { %v323_v48 = vmul.f32 0.5, %v321_v46 }
 0x22e   :  { %v324_v49 = vpack.c.bf16 %v323_v48, %v322_v47 }
 0x230   :  { %587 = vmatmul.mubr.bf16.vlgmr.msra.gmra.mrb[4].mxu0 %v324_v49 }
 0x303   :  { %v430_v51 = vpop.f32.mrb[4].mxu0 }
 0x304   :  { %v588_v52 = vpop.f32.mrb[5].mxu0  ;;  %v431_v54 = vadd.f32 %v485_v50, %v430_v51 }
 0x305   :  { %v433_v53 = vpop.f32.mrb[6].mxu0 }
 0x306   :  { %v434_v55 = vadd.f32 %v485_v50, %v433_v53  ;;  %v589_v56 = vpop.f32.mrb[7].mxu0 }
 0x308   :  { %v501_v57 = vpack.c.bf16 %v434_v55, %v431_v54 }
 0x30a   :  { %502 = vst [vmem:[#allocation10] sm:$0xff] %v501_v57  }
 0x30b   :  { %727 = shalt.err (!%p724_p8)
}
 0x30c   :  { %s728_s11 = scalar_lea.hbm %s930_s7, 128 }
 0x30d   :  { %p729_p9 = scmp.ne.s32.totalorder %s930_s7, %s728_s11  ;;  %p732_p10 = scmp.lt.u32.totalorder %s728_s11, %s930_s7 }
 0x30f   :  { %p734_p11 = pnand %p732_p10, %p729_p9 }
 0x311   :  { %737 = shalt.err (!%p734_p11)
}
 0x312   :  { %458 = dma.vmem_to_hbm [thread:$0]  %s453_s8, 128, %s930_s7, [#allocation4], %s748_s13, %s748_s13, %s749_s14  }
 0x313   :  { %744 = dma.done.wait [#allocation4], 128  }
 0x314   :  { %745 = vsyncadd [#allocation4], 4294967168 }
 0x315   :  { %462 = vsyncpa [#allocation3], 1 }
 0x316   :  { %463 = vsyncpa [#allocation6], 1 }
 0x317   :  { %464 = vsyncpa [#allocation9], 1 }
 0x318   :  { %465 = vsyncpa [#allocation4], 1 }

// kernel: tpu_custom_call.1
= control target key start
LH: loop header
LB: loop body
LE: loop exit
PB: predicated region body
PF: predicated region fallthrough
CT: control target
= control target key end

     0   :  { %12 = vsyncpa [#allocation3], 0  ;;  %s923_s0 = inlined_call_operand.hbm [shape: bf16[16,128], index: 0, kind: input, shape index: {}]   ;;  %s924_s1 = inlined_call_operand.hbm [shape: bf16[128,128], index: 1, kind: input, shape index: {}]   ;;  %s925_s2 = inlined_call_operand.vmem [shape: f32[1,128], index: 2, kind: input, shape index: {}]   ;;  %s926_s3 = inlined_call_operand.hbm [shape: bf16[128,128], index: 3, kind: input, shape index: {}]   ;;  %s927_s4 = inlined_call_operand.vmem [shape: f32[1,128], index: 4, kind: input, shape index: {}]   ;;  %s928_s5 = inlined_call_operand.hbm [shape: bf16[128,128], index: 5, kind: input, shape index: {}]   ;;  %s929_s6 = inlined_call_operand.vmem [shape: f32[1,128], index: 6, kind: input, shape index: {}]   ;;  %s930_s7 = inlined_call_operand.hbm [shape: bf16[16,128], index: 7, kind: output, shape index: {}]  }
   0x1   :  { %13 = vsyncpa [#allocation6], 0 }
   0x2   :  { %14 = vsyncpa [#allocation9], 0 }
   0x3   :  { %15 = vsyncpa [#allocation4], 0  ;;  %s746_s24 = smov [#allocation5]   ;;  %s747_s26 = smov [#allocation2]  }
   0x4   :  { %s33_s25 = sshll.u32 %s746_s24, 4  ;;  %s21_s27 = sshll.u32 %s747_s26, 4  ;;  %s34_s25 = int_to_ptr.vmem [resolvable:$true] %s33_s25  ;;  %s795_s27 = int_to_ptr.vmem [resolvable:$true] %s21_s27 }
   0x5   :  { %s628_s30 = scalar_lea.hbm %s924_s1, 1024 }
   0x6   :  { %p629_p0 = scmp.ne.s32.totalorder %s924_s1, %s628_s30  ;;  %p632_p1 = scmp.lt.u32.totalorder %s628_s30, %s924_s1 }
   0x8   :  { %p634_p2 = pnand %p632_p1, %p629_p0 }
   0xa   :  { %637 = shalt.err (!%p634_p2)
}
   0xb   :  { %s638_s12 = scalar_lea.vmem %s34_s25, 1024  ;;  %p643_p4 = scmp.lt.s32.totalorder %s34_s25, %s34_s25 }
   0xc   :  { %p639_p3 = scmp.ne.s32.totalorder %s34_s25, %s638_s12  ;;  %p644_p5 = scmp.lt.s32.totalorder %s638_s12, %s638_s12 }
   0xe   :  { %p645_p6 = por %p644_p5, %p643_p4 }
  0x10   :  { %p646_p7 = pnand %p645_p6, %p639_p3 }
  0x12   :  { %649 = shalt.err (!%p646_p7)
}
  0x13   :  { %s748_s13 = smov 64   ;;  %s749_s14 = smov 4  }
  0x14   :  { %39 = dma.hbm_to_vmem [thread:$0]  %s924_s1, 1024, %s34_s25, [#allocation6], %s748_s13, %s748_s13, %s749_s14  }
  0x15   :  { %s650_s19 = scalar_lea.hbm %s923_s0, 128 }
  0x16   :  { %p651_p8 = scmp.ne.s32.totalorder %s923_s0, %s650_s19  ;;  %p654_p9 = scmp.lt.u32.totalorder %s650_s19, %s923_s0 }
  0x18   :  { %p656_p10 = pnand %p654_p9, %p651_p8 }
  0x1a   :  { %659 = shalt.err (!%p656_p10)
}
  0x1b   :  { %s660_s24 = scalar_lea.vmem %s795_s27, 128  ;;  %p665_p12 = scmp.lt.s32.totalorder %s795_s27, %s795_s27 }
  0x1c   :  { %p661_p11 = scmp.ne.s32.totalorder %s795_s27, %s660_s24  ;;  %p666_p13 = scmp.lt.s32.totalorder %s660_s24, %s660_s24 }
  0x1e   :  { %p667_p0 = por %p666_p13, %p665_p12 }
  0x20   :  { %p668_p1 = pnand %p667_p0, %p661_p11 }
  0x22   :  { %671 = shalt.err (!%p668_p1)
}
  0x23   :  { %27 = dma.hbm_to_vmem [thread:$0]  %s923_s0, 128, %s795_s27, [#allocation3], %s748_s13, %s748_s13, %s749_s14  }
  0x24   :  { %s750_s26 = smov [#allocation7]   ;;  %s751_s29 = smov [#allocation8]  }
  0x25   :  { %s47_s28 = sshll.u32 %s750_s26, 4  ;;  %s61_s30 = sshll.u32 %s751_s29, 4  ;;  %s48_s28 = int_to_ptr.vmem [resolvable:$true] %s47_s28  ;;  %s832_s30 = int_to_ptr.vmem [resolvable:$true] %s61_s30 }
  0x26   :  { %s672_s10 = scalar_lea.hbm %s926_s3, 1024 }
  0x27   :  { %p673_p2 = scmp.ne.s32.totalorder %s926_s3, %s672_s10  ;;  %p676_p3 = scmp.lt.u32.totalorder %s672_s10, %s926_s3 }
  0x29   :  { %p678_p4 = pnand %p676_p3, %p673_p2 }
  0x2b   :  { %681 = shalt.err (!%p678_p4)
}
  0x2c   :  { %s682_s0 = scalar_lea.vmem %s48_s28, 1024  ;;  %p687_p6 = scmp.lt.s32.totalorder %s48_s28, %s48_s28 }
  0x2d   :  { %p683_p5 = scmp.ne.s32.totalorder %s48_s28, %s682_s0  ;;  %p688_p7 = scmp.lt.s32.totalorder %s682_s0, %s682_s0 }
  0x2f   :  { %p689_p8 = por %p688_p7, %p687_p6 }
  0x31   :  { %p690_p9 = pnand %p689_p8, %p683_p5 }
  0x33   :  { %693 = shalt.err (!%p690_p9)
}
  0x34   :  { %53 = dma.hbm_to_vmem [thread:$0]  %s926_s3, 1024, %s48_s28, [#allocation6], %s748_s13, %s748_s13, %s749_s14  }
  0x35   :  { %s694_s20 = scalar_lea.hbm %s928_s5, 1024 }
  0x36   :  { %p695_p10 = scmp.ne.s32.totalorder %s928_s5, %s694_s20  ;;  %p698_p11 = scmp.lt.u32.totalorder %s694_s20, %s928_s5 }
  0x38   :  { %p700_p12 = pnand %p698_p11, %p695_p10 }
  0x3a   :  { %703 = shalt.err (!%p700_p12)
}
  0x3b   :  { %s704_s1 = scalar_lea.vmem %s832_s30, 1024  ;;  %p709_p0 = scmp.lt.s32.totalorder %s832_s30, %s832_s30 }
  0x3c   :  { %p705_p13 = scmp.ne.s32.totalorder %s832_s30, %s704_s1  ;;  %p710_p1 = scmp.lt.s32.totalorder %s704_s1, %s704_s1 }
  0x3e   :  { %p711_p2 = por %p710_p1, %p709_p0 }
  0x40   :  { %p712_p3 = pnand %p711_p2, %p705_p13 }
  0x42   :  { %715 = shalt.err (!%p712_p3)
}
  0x43   :  { %67 = dma.hbm_to_vmem [thread:$0]  %s928_s5, 1024, %s832_s30, [#allocation9], %s748_s13, %s748_s13, %s749_s14  }
  0x44   :  { %738 = dma.done.wait [#allocation3], 128  }
  0x45   :  { %739 = vsyncadd [#allocation3], 4294967168 }
  0x46   :  { %740 = dma.done.wait [#allocation6], 2048  }
  0x47   :  { %741 = vsyncadd [#allocation6], 4294965248 }
  0x48   :  { %742 = dma.done.wait [#allocation9], 1024  }
  0x49   :  { %743 = vsyncadd [#allocation9], 4294966272  ;;  %v752_v0 = vmov 0.0   ;;  %vm753_vm0 = vmmov 0   ;;  %v599_v1 = vld [vmem:[#allocation5] sm:$0xff]   ;;  %v600_v2 = vld [vmem:[#allocation5 + $0x8] sm:$0xff]  }
  0x4a   :  { %530 = vmatprep.subr.bf16.mxu0 %v752_v0  ;;  %546 = vmatprep.mubr.msk.bf16.mxu0 %vm753_vm0, %v752_v0  ;;  %v601_v3 = vld [vmem:[#allocation5 + $0x10] sm:$0xff]   ;;  %v608_v4 = vld [vmem:[#allocation7] sm:$0xff]   ;;  %v602_v5 = vld [vmem:[#allocation5 + $0x18] sm:$0xff]   ;;  %s754_s30 = smov [#allocation10]  }
  0x4b   :  { %550 = vmatprep.subr.bf16.mxu1 %v752_v0  ;;  %566 = vmatprep.mubr.msk.bf16.mxu1 %vm753_vm0, %v752_v0  ;;  %v609_v6 = vld [vmem:[#allocation7 + $0x8] sm:$0xff]   ;;  %v603_v7 = vld [vmem:[#allocation5 + $0x20] sm:$0xff]   ;;  %v610_v8 = vld [vmem:[#allocation7 + $0x10] sm:$0xff]   ;;  %s452_s8 = sshll.u32 %s754_s30, 4  ;;  %s453_s8 = int_to_ptr.vmem [resolvable:$true] %s452_s8 }
  0x4c   :  { %531 = vmatpush3.bf16.msra.mxu0 %v599_v1  ;;  %551 = vmatpush3.bf16.msra.mxu1 %v608_v4  ;;  %v604_v9 = vld [vmem:[#allocation5 + $0x28] sm:$0xff]   ;;  %v611_v10 = vld [vmem:[#allocation7 + $0x18] sm:$0xff]   ;;  %v605_v11 = vld [vmem:[#allocation5 + $0x30] sm:$0xff]   ;;  %s716_s9 = scalar_lea.vmem %s453_s8, 128  ;;  %p721_p5 = scmp.lt.s32.totalorder %s453_s8, %s453_s8 }
  0x4d   :  { %532 = vmatprep.subr.bf16.mxu0 %v752_v0  ;;  %552 = vmatprep.subr.bf16.mxu1 %v752_v0  ;;  %v612_v12 = vld [vmem:[#allocation7 + $0x20] sm:$0xff]   ;;  %v606_v13 = vld [vmem:[#allocation5 + $0x38] sm:$0xff]   ;;  %v613_v14 = vld [vmem:[#allocation7 + $0x28] sm:$0xff]   ;;  %p717_p4 = scmp.ne.s32.totalorder %s453_s8, %s716_s9  ;;  %p722_p6 = scmp.lt.s32.totalorder %s716_s9, %s716_s9 }
  0x4e   :  { %v607_v15 = vld [vmem:[#allocation2] sm:$0xff]   ;;  %v614_v16 = vld [vmem:[#allocation7 + $0x30] sm:$0xff]   ;;  %v616_v18 = vld [vmem:[#allocation8] sm:$0xff]  }
  0x4f   :  { %v615_v17 = vld [vmem:[#allocation7 + $0x38] sm:$0xff]   ;;  %v617_v19 = vld [vmem:[#allocation8 + $0x8] sm:$0xff]   ;;  %v618_v28 = vld [vmem:[#allocation8 + $0x10] sm:$0xff]   ;;  %p723_p7 = por %p722_p6, %p721_p5 }
  0x50   :  { %533 = vmatpush3.bf16.msra.mxu0 %v600_v2  ;;  %553 = vmatpush3.bf16.msra.mxu1 %v609_v6  ;;  %v466_v20 = vld [vmem:[%s925_s2] ss:$0 sm:$0xff]  ;;  %v620_v30 = vld [vmem:[#allocation8 + $0x20] sm:$0xff]   ;;  %v621_v31 = vld [vmem:[#allocation8 + $0x28] sm:$0xff]  }
  0x51   :  { %534 = vmatprep.subr.bf16.mxu0 %v752_v0  ;;  %554 = vmatprep.subr.bf16.mxu1 %v752_v0  ;;  %v619_v29 = vld [vmem:[#allocation8 + $0x18] sm:$0xff]   ;;  %v622_v32 = vld [vmem:[#allocation8 + $0x30] sm:$0xff]   ;;  %p724_p8 = pnand %p723_p7, %p717_p4 }
  0x52   :  { %v623_v33 = vld [vmem:[#allocation8 + $0x38] sm:$0xff]  }
  0x53   :  { %v476_v34 = vld [vmem:[%s927_s4] ss:$0 sm:$0xff] }
  0x54   :  { %535 = vmatpush3.bf16.msra.mxu0 %v601_v3  ;;  %555 = vmatpush3.bf16.msra.mxu1 %v610_v8  ;;  %v485_v50 = vld [vmem:[%s929_s6] ss:$0 sm:$0xff] }
  0x55   :  { %536 = vmatprep.subr.bf16.mxu0 %v752_v0  ;;  %556 = vmatprep.subr.bf16.mxu1 %v752_v0 }
  0x58   :  { %537 = vmatpush3.bf16.msra.mxu0 %v602_v5  ;;  %557 = vmatpush3.bf16.msra.mxu1 %v611_v10 }
  0x59   :  { %538 = vmatprep.subr.bf16.mxu0 %v752_v0  ;;  %558 = vmatprep.subr.bf16.mxu1 %v752_v0 }
  0x5c   :  { %539 = vmatpush3.bf16.msra.mxu0 %v603_v7  ;;  %559 = vmatpush3.bf16.msra.mxu1 %v612_v12 }
  0x5d   :  { %540 = vmatprep.subr.bf16.mxu0 %v752_v0  ;;  %560 = vmatprep.subr.bf16.mxu1 %v752_v0 }
  0x60   :  { %541 = vmatpush3.bf16.msra.mxu0 %v604_v9  ;;  %561 = vmatpush3.bf16.msra.mxu1 %v613_v14 }
  0x61   :  { %542 = vmatprep.subr.bf16.mxu0 %v752_v0  ;;  %562 = vmatprep.subr.bf16.mxu1 %v752_v0 }
  0x64   :  { %543 = vmatpush3.bf16.msra.mxu0 %v605_v11  ;;  %563 = vmatpush3.bf16.msra.mxu1 %v614_v16 }
  0x65   :  { %544 = vmatprep.subr.bf16.mxu0 %v752_v0  ;;  %564 = vmatprep.subr.bf16.mxu1 %v752_v0 }
  0x68   :  { %545 = vmatpush3.bf16.msra.mxu0 %v606_v13  ;;  %565 = vmatpush3.bf16.msra.mxu1 %v615_v17 }
  0x69   :  { %570 = vmatprep.subr.bf16.mxu0 %v752_v0 }
  0x6b   :  { %547 = vmatmul.mubr.bf16.vlgmr.msra.gmra.mrb[0].mxu0 %v607_v15 }
  0x6c   :  { %586 = vmatprep.mubr.msk.bf16.mxu0 %vm753_vm0, %v752_v0  ;;  %571 = vmatpush3.bf16.msra.mxu0 %v616_v18 }
  0x6d   :  { %572 = vmatprep.subr.bf16.mxu0 %v752_v0 }
  0x70   :  { %573 = vmatpush3.bf16.msra.mxu0 %v617_v19 }
  0x71   :  { %574 = vmatprep.subr.bf16.mxu0 %v752_v0 }
  0x74   :  { %575 = vmatpush3.bf16.msra.mxu0 %v618_v28 }
  0x75   :  { %576 = vmatprep.subr.bf16.mxu0 %v752_v0 }
  0x78   :  { %577 = vmatpush3.bf16.msra.mxu0 %v619_v29 }
  0x79   :  { %578 = vmatprep.subr.bf16.mxu0 %v752_v0 }
  0x7c   :  { %579 = vmatpush3.bf16.msra.mxu0 %v620_v30 }
  0x7d   :  { %580 = vmatprep.subr.bf16.mxu0 %v752_v0 }
  0x80   :  { %581 = vmatpush3.bf16.msra.mxu0 %v621_v31 }
  0x81   :  { %582 = vmatprep.subr.bf16.mxu0 %v752_v0 }
  0x84   :  { %583 = vmatpush3.bf16.msra.mxu0 %v622_v32 }
  0x85   :  { %584 = vmatprep.subr.bf16.mxu0 %v752_v0 }
  0x88   :  { %585 = vmatpush3.bf16.msra.mxu0 %v623_v33 }
 0x13e   :  { %v196_v21 = vpop.f32.mrb[0].mxu0 }
 0x13f   :  { %v548_v22 = vpop.f32.mrb[1].mxu0  ;;  %v197_v24 = vadd.f32 %v466_v20, %v196_v21 }
 0x140   :  { %v199_v23 = vpop.f32.mrb[2].mxu0 }
 0x141   :  { %v200_v25 = vadd.f32 %v466_v20, %v199_v23  ;;  %v549_v26 = vpop.f32.mrb[3].mxu0 }
 0x143   :  { %v203_v27 = vpack.c.bf16 %v200_v25, %v197_v24 }
 0x145   :  { %567 = vmatmul.mubr.bf16.vlgmr.msra.gmra.mrb[0].mxu1 %v203_v27 }
 0x218   :  { %v309_v35 = vpop.f32.mrb[0].mxu1 }
 0x219   :  { %v310_v36 = vadd.f32 %v476_v34, %v309_v35  ;;  %v568_v37 = vpop.f32.mrb[1].mxu1 }
 0x21a   :  { %v312_v38 = vpop.f32.mrb[2].mxu1 }
 0x21b   :  { %v316_v39 = vmul.f32 0.5, %v310_v36  ;;  %v313_v40 = vadd.f32 %v476_v34, %v312_v38  ;;  %v569_v41 = vpop.f32.mrb[3].mxu1 }
 0x21d   :  { %624 = vtanh.f32 %v316_v39  ;;  %v317_v42 = vmul.f32 0.5, %v313_v40 }
 0x21f   :  { %626 = vtanh.f32 %v317_v42 }
 0x227   :  { %v625_v43 = vpop.eup %624 }
 0x228   :  { %v320_v44 = vadd.f32 1.0, %v625_v43 }
 0x229   :  { %v627_v45 = vpop.eup %626 }
 0x22a   :  { %v321_v46 = vadd.f32 1.0, %v627_v45  ;;  %v322_v47 = vmul.f32 0.5, %v320_v44 }
 0x22c   :  { %v323_v48 = vmul.f32 0.5, %v321_v46 }
 0x22e   :  { %v324_v49 = vpack.c.bf16 %v323_v48, %v322_v47 }
 0x230   :  { %587 = vmatmul.mubr.bf16.vlgmr.msra.gmra.mrb[4].mxu0 %v324_v49 }
 0x303   :  { %v430_v51 = vpop.f32.mrb[4].mxu0 }
 0x304   :  { %v588_v52 = vpop.f32.mrb[5].mxu0  ;;  %v431_v54 = vadd.f32 %v485_v50, %v430_v51 }
 0x305   :  { %v433_v53 = vpop.f32.mrb[6].mxu0 }
 0x306   :  { %v434_v55 = vadd.f32 %v485_v50, %v433_v53  ;;  %v589_v56 = vpop.f32.mrb[7].mxu0 }
 0x308   :  { %v501_v57 = vpack.c.bf16 %v434_v55, %v431_v54 }
 0x30a   :  { %502 = vst [vmem:[#allocation10] sm:$0xff] %v501_v57  }
 0x30b   :  { %727 = shalt.err (!%p724_p8)
}
 0x30c   :  { %s728_s11 = scalar_lea.hbm %s930_s7, 128 }
 0x30d   :  { %p729_p9 = scmp.ne.s32.totalorder %s930_s7, %s728_s11  ;;  %p732_p10 = scmp.lt.u32.totalorder %s728_s11, %s930_s7 }
 0x30f   :  { %p734_p11 = pnand %p732_p10, %p729_p9 }
 0x311   :  { %737 = shalt.err (!%p734_p11)
}
 0x312   :  { %458 = dma.vmem_to_hbm [thread:$0]  %s453_s8, 128, %s930_s7, [#allocation4], %s748_s13, %s748_s13, %s749_s14  }
 0x313   :  { %744 = dma.done.wait [#allocation4], 128  }
 0x314   :  { %745 = vsyncadd [#allocation4], 4294967168 }
 0x315   :  { %462 = vsyncpa [#allocation3], 1 }
 0x316   :  { %463 = vsyncpa [#allocation6], 1 }
 0x317   :  { %464 = vsyncpa [#allocation9], 1 }
 0x318   :  { %465 = vsyncpa [#allocation4], 1 }

</bundles_post_ra>
